<compile_context>
chip_gen: v7x
topology: tpu7x:2x2x1
jax: 0.10.0
libtpu: 0.0.40
codegen_flags: <defaults>
</compile_context>

<pallas_src>
import functools

import jax
import jax.numpy as jnp
from jax.experimental import pallas as pl
from jax.experimental.pallas import tpu as pltpu


def _round_up(x, m):
    return -(-x // m) * m


def _choose_time_chunk(T, cap=32):
    """Largest divisor of T that is <= cap (timesteps handled per grid step)."""
    for c in range(min(T, cap), 0, -1):
        if T % c == 0:
            return c
    return 1


def _choose_batch_tile(B_pad):
    """Sublane-aligned batch tile; splits big batches across cores (v7x megacore)."""
    if B_pad <= 8:
        return B_pad
    for bt in (256, 128, 64, 32, 16, 8):
        if B_pad % bt == 0:
            return bt
    return B_pad


def lstm_fc_kernel(gx_ref, whh_ref, wfc_ref, bfc_ref, out_ref, h_scr, c_scr,
                   *, hidden_dim, chunk):
    """One grid step = `chunk` LSTM timesteps for one batch tile.

    gx_ref : [chunk, Bt, 4H]  precomputed x@W_ih^T + b for these timesteps
    whh_ref: [H, 4H]          recurrent weights (W_hh^T), grid-invariant
    wfc_ref: [H, O_pad]       FC weights (W_fc^T, lane-padded), grid-invariant
    bfc_ref: [1, O_pad]       FC bias (lane-padded)
    out_ref: [Bt, O_pad]      resident output tile, written once at the last chunk
    h_scr/c_scr: [Bt, H]      LSTM state carried across time chunks in VMEM
    """
    c_idx = pl.program_id(1)          # time-chunk index (sequential axis)
    n_chunks = pl.num_programs(1)

    @pl.when(c_idx == 0)
    def _():
        h_scr[...] = jnp.zeros_like(h_scr)
        c_scr[...] = jnp.zeros_like(c_scr)

    H = hidden_dim
    whh = whh_ref[...]                # hoisted: one VMEM load, reused for the whole chunk

    def step(t, carry):
        h, c = carry
        # Only the recurrent matmul is on the sequential critical path; the x-projection
        # and bias are already folded into gx.
        gates = gx_ref[t] + jnp.dot(h, whh, preferred_element_type=jnp.float32)
        i_g = jax.nn.sigmoid(gates[:, 0 * H:1 * H])
        f_g = jax.nn.sigmoid(gates[:, 1 * H:2 * H])
        g_g = jnp.tanh(gates[:, 2 * H:3 * H])
        o_g = jax.nn.sigmoid(gates[:, 3 * H:4 * H])
        c_new = f_g * c + i_g * g_g
        h_new = o_g * jnp.tanh(c_new)
        return (h_new, c_new)

    # State carried in vregs through the unrolled chunk; scratch touched once per chunk.
    h_fin, c_fin = jax.lax.fori_loop(0, chunk, step, (h_scr[...], c_scr[...]),
                                     unroll=True)
    h_scr[...] = h_fin
    c_scr[...] = c_fin

    @pl.when(c_idx == n_chunks - 1)
    def _():
        fc = (jnp.dot(h_fin, wfc_ref[...], preferred_element_type=jnp.float32)
              + bfc_ref[...])
        out_ref[...] = fc.astype(out_ref.dtype)


def spatial_point_model_forward(x, params, *, time_chunk=None):
    """x: [B, T, D] float32 (batch_first, like the PyTorch module). Returns [B, O]."""
    B, T, D = x.shape
    w_ih_t = params["w_ih_t"]      # [D, 4H]
    w_hh_t = params["w_hh_t"]      # [H, 4H]
    b_gates = params["b_gates"]    # [1, 4H]  (b_ih + b_hh)
    w_fc_t = params["w_fc_t"]      # [H, O]
    b_fc = params["b_fc"]          # [1, O]
    H = w_hh_t.shape[0]
    O = w_fc_t.shape[1]
    G = 4 * H

    # --- padding: batch to sublane multiple, FC output to a full lane tile -------------
    B_pad = max(8, _round_up(B, 8))
    O_pad = max(128, _round_up(O, 128))
    if B_pad != B:
        x = jnp.pad(x, ((0, B_pad - B), (0, 0), (0, 0)))
    wfc_p = jnp.pad(w_fc_t, ((0, 0), (0, O_pad - O))) if O_pad != O else w_fc_t
    bfc_p = jnp.pad(b_fc, ((0, 0), (0, O_pad - O))) if O_pad != O else b_fc

    # --- hoisted input projection: one big MXU matmul, off the sequential path ---------
    # Folds the time-major layout change ([T, B, 4H]) and the gate bias.
    gates_x = jnp.einsum("btd,dg->tbg", x, w_ih_t,
                         preferred_element_type=jnp.float32) + b_gates

    # --- grid: (batch tiles [parallel], time chunks [arbitrary/sequential]) ------------
    Tc = time_chunk if time_chunk is not None else _choose_time_chunk(T)
    assert T % Tc == 0
    Bt = _choose_batch_tile(B_pad)
    n_b = B_pad // Bt
    n_c = T // Tc

    cost = pl.CostEstimate(
        flops=2 * T * B_pad * H * G + 12 * T * B_pad * H + 2 * B_pad * H * O_pad,
        transcendentals=5 * T * B_pad * H,
        bytes_accessed=4 * (T * B_pad * G + H * G + H * O_pad + O_pad + B_pad * O_pad),
    )

    kernel = functools.partial(lstm_fc_kernel, hidden_dim=H, chunk=Tc)
    out = pl.pallas_call(
        kernel,
        out_shape=jax.ShapeDtypeStruct((B_pad, O_pad), jnp.float32),
        grid=(n_b, n_c),
        in_specs=[
            pl.BlockSpec((Tc, Bt, G), lambda b, c: (c, b, 0)),    # gates_x chunk
            pl.BlockSpec((H, G), lambda b, c: (0, 0)),            # W_hh^T (grid-invariant)
            pl.BlockSpec((H, O_pad), lambda b, c: (0, 0)),        # W_fc^T (grid-invariant)
            pl.BlockSpec((1, O_pad), lambda b, c: (0, 0)),        # b_fc
        ],
        out_specs=pl.BlockSpec((Bt, O_pad), lambda b, c: (b, 0)),  # resident output tile
        scratch_shapes=[pltpu.VMEM((Bt, H), jnp.float32),          # h
                        pltpu.VMEM((Bt, H), jnp.float32)],         # c
        compiler_params=pltpu.CompilerParams(
            dimension_semantics=("parallel", "arbitrary")),
        cost_estimate=cost,
    )(gates_x, w_hh_t, wfc_p, bfc_p)

    return out[:B, :O]


def init_params(key, input_dim, hidden_dim, output_dim):
    """Deterministic init mimicking PyTorch's uniform(-1/sqrt(H), 1/sqrt(H))."""
    k_lstm = 1.0 / jnp.sqrt(hidden_dim)
    k_fc = 1.0 / jnp.sqrt(hidden_dim)
    ks = jax.random.split(key, 6)
    w_ih = jax.random.uniform(ks[0], (4 * hidden_dim, input_dim), jnp.float32,
                              -k_lstm, k_lstm)
    w_hh = jax.random.uniform(ks[1], (4 * hidden_dim, hidden_dim), jnp.float32,
                              -k_lstm, k_lstm)
    b_ih = jax.random.uniform(ks[2], (4 * hidden_dim,), jnp.float32, -k_lstm, k_lstm)
    b_hh = jax.random.uniform(ks[3], (4 * hidden_dim,), jnp.float32, -k_lstm, k_lstm)
    w_fc = jax.random.uniform(ks[4], (output_dim, hidden_dim), jnp.float32, -k_fc, k_fc)
    b_fc = jax.random.uniform(ks[5], (output_dim,), jnp.float32, -k_fc, k_fc)
    return {
        "w_ih_t": w_ih.T,                       # [D, 4H]
        "w_hh_t": w_hh.T,                       # [H, 4H]
        "b_gates": (b_ih + b_hh)[None, :],      # [1, 4H]
        "w_fc_t": w_fc.T,                       # [H, O]
        "b_fc": b_fc[None, :],                  # [1, O]
    }


def reference_forward(x, params):
    """Pure-JAX reference (lax.scan LSTM) for correctness check."""
    B, T, D = x.shape
    H = params["w_hh_t"].shape[0]

    def step(carry, x_t):
        h, c = carry
        gates = x_t @ params["w_ih_t"] + h @ params["w_hh_t"] + params["b_gates"]
        i_g = jax.nn.sigmoid(gates[:, 0 * H:1 * H])
        f_g = jax.nn.sigmoid(gates[:, 1 * H:2 * H])
        g_g = jnp.tanh(gates[:, 2 * H:3 * H])
        o_g = jax.nn.sigmoid(gates[:, 3 * H:4 * H])
        c_new = f_g * c + i_g * g_g
        h_new = o_g * jnp.tanh(c_new)
        return (h_new, c_new), None

    h0 = jnp.zeros((B, H), jnp.float32)
    c0 = jnp.zeros((B, H), jnp.float32)
    (h_T, _), _ = jax.lax.scan(step, (h0, c0), jnp.transpose(x, (1, 0, 2)))
    return h_T @ params["w_fc_t"] + params["b_fc"]


if __name__ == "__main__":
    B, T, D, H, O = 2, 8, 4, 32, 4   # batch, seq, input_dim, hidden_dim, output_dim

    key = jax.random.PRNGKey(0)
    k_x, k_p = jax.random.split(key)
    x = jax.random.normal(k_x, (B, T, D), jnp.float32)
    params = init_params(k_p, D, H, O)

    out = spatial_point_model_forward(x, params)
    out = jax.block_until_ready(out)

    ref = reference_forward(x, params)
    assert out.shape == (B, O)
    assert jnp.allclose(out, ref, rtol=1e-3, atol=1e-3), "mismatch vs pure-JAX LSTM reference"

    print("KERNEL_OK")
</pallas_src>

<mosaic_0001>
module attributes {stable_mosaic.version = 11 : i64} {
  func.func @lstm_fc_kernel(%arg0: i32, %arg1: i32, %arg2: memref<8x8x128xf32, #tpu.memory_space<vmem>>, %arg3: memref<32x128xf32, #tpu.memory_space<vmem>>, %arg4: memref<32x128xf32, #tpu.memory_space<vmem>>, %arg5: memref<1x128xf32, #tpu.memory_space<vmem>>, %arg6: memref<8x128xf32, #tpu.memory_space<vmem>>, %arg7: memref<8x32xf32, #tpu.memory_space<vmem>>, %arg8: memref<8x32xf32, #tpu.memory_space<vmem>>) attributes {dimension_semantics = [#tpu.dimension_semantics<parallel>, #tpu.dimension_semantics<arbitrary>], iteration_bounds = array<i64: 1, 1>, scalar_prefetch = 0 : i64, scratch_operands = 2 : i64, tpu.core_type = #tpu.core_type<tc>, window_params = [{transform_indices = @transform_0, window_bounds = array<i64: 8, 8, 128>}, {pipeline_mode = #tpu.pipeline_mode<synchronous>, transform_indices = @transform_1, window_bounds = array<i64: 32, 128>}, {pipeline_mode = #tpu.pipeline_mode<synchronous>, transform_indices = @transform_2, window_bounds = array<i64: 32, 128>}, {pipeline_mode = #tpu.pipeline_mode<synchronous>, transform_indices = @transform_3, window_bounds = array<i64: 1, 128>}, {transform_indices = @transform_4, window_bounds = array<i64: 8, 128>}]} {
    %c0_i32 = arith.constant 0 : i32
    %0 = arith.cmpi eq, %arg1, %c0_i32 : i32
    %1 = arith.extui %0 : i1 to i32
    %c0_i32_0 = arith.constant 0 : i32
    %2 = arith.cmpi ne, %1, %c0_i32_0 : i32
    scf.if %2 {
      %cst_60 = arith.constant 0.000000e+00 : f32
      %251 = vector.broadcast %cst_60 : f32 to vector<8x32xf32>
      %c0_61 = arith.constant 0 : index
      %c0_62 = arith.constant 0 : index
      %252 = vector.load %arg7[%c0_61, %c0_62] : memref<8x32xf32, #tpu.memory_space<vmem>>, vector<8x32xf32>
      tpu.vector_store %arg7[%c0_61, %c0_62], %251 {strides = array<i32>} : memref<8x32xf32, #tpu.memory_space<vmem>>, vector<8x32xf32>,
      %cst_63 = arith.constant 0.000000e+00 : f32
      %253 = vector.broadcast %cst_63 : f32 to vector<8x32xf32>
      %c0_64 = arith.constant 0 : index
      %c0_65 = arith.constant 0 : index
      %254 = vector.load %arg8[%c0_64, %c0_65] : memref<8x32xf32, #tpu.memory_space<vmem>>, vector<8x32xf32>
      tpu.vector_store %arg8[%c0_64, %c0_65], %253 {strides = array<i32>} : memref<8x32xf32, #tpu.memory_space<vmem>>, vector<8x32xf32>,
    } else {
    }
    %c0 = arith.constant 0 : index
    %c0_1 = arith.constant 0 : index
    %3 = vector.load %arg3[%c0, %c0_1] : memref<32x128xf32, #tpu.memory_space<vmem>>, vector<32x128xf32>
    %c0_2 = arith.constant 0 : index
    %c0_3 = arith.constant 0 : index
    %4 = vector.load %arg7[%c0_2, %c0_3] : memref<8x32xf32, #tpu.memory_space<vmem>>, vector<8x32xf32>
    %c0_4 = arith.constant 0 : index
    %c0_5 = arith.constant 0 : index
    %5 = vector.load %arg8[%c0_4, %c0_5] : memref<8x32xf32, #tpu.memory_space<vmem>>, vector<8x32xf32>
    %c0_i32_6 = arith.constant 0 : i32
    %6 = arith.index_cast %c0_i32_6 : i32 to index
    %c0_7 = arith.constant 0 : index
    %c0_8 = arith.constant 0 : index
    %7 = vector.load %arg2[%6, %c0_7, %c0_8] : memref<8x8x128xf32, #tpu.memory_space<vmem>>, vector<1x8x128xf32>
    %8 = vector.shape_cast %7 : vector<1x8x128xf32> to vector<8x128xf32>
    %cst = arith.constant dense<0.000000e+00> : vector<8x128xf32>
    %9 = tpu.matmul %4, %3, %cst {dimension_numbers = #tpu.dot_dimension_numbers<[1], [0], [0], [1], [0, 0, 1, 1], [], []>} : vector<8x32xf32>, vector<32x128xf32>, vector<8x128xf32> -> vector<8x128xf32>
    %10 = arith.addf %8, %9 : vector<8x128xf32>
    %11 = vector.extract_strided_slice %10 {offsets = [0, 0], sizes = [8, 32], strides = [1, 1]} : vector<8x128xf32> to vector<8x32xf32>
    %12 = arith.negf %11 : vector<8x32xf32>
    %13 = math.exp %12 : vector<8x32xf32>
    %cst_9 = arith.constant 1.000000e+00 : f32
    %14 = vector.broadcast %cst_9 : f32 to vector<8x32xf32>
    %15 = arith.addf %14, %13 : vector<8x32xf32>
    %16 = arith.divf %14, %15 : vector<8x32xf32>
    %17 = vector.extract_strided_slice %10 {offsets = [0, 32], sizes = [8, 32], strides = [1, 1]} : vector<8x128xf32> to vector<8x32xf32>
    %18 = arith.negf %17 : vector<8x32xf32>
    %19 = math.exp %18 : vector<8x32xf32>
    %cst_10 = arith.constant 1.000000e+00 : f32
    %20 = vector.broadcast %cst_10 : f32 to vector<8x32xf32>
    %21 = arith.addf %20, %19 : vector<8x32xf32>
    %22 = arith.divf %20, %21 : vector<8x32xf32>
    %23 = vector.extract_strided_slice %10 {offsets = [0, 64], sizes = [8, 32], strides = [1, 1]} : vector<8x128xf32> to vector<8x32xf32>
    %24 = math.tanh %23 : vector<8x32xf32>
    %25 = vector.extract_strided_slice %10 {offsets = [0, 96], sizes = [8, 32], strides = [1, 1]} : vector<8x128xf32> to vector<8x32xf32>
    %26 = arith.negf %25 : vector<8x32xf32>
    %27 = math.exp %26 : vector<8x32xf32>
    %cst_11 = arith.constant 1.000000e+00 : f32
    %28 = vector.broadcast %cst_11 : f32 to vector<8x32xf32>
    %29 = arith.addf %28, %27 : vector<8x32xf32>
    %30 = arith.divf %28, %29 : vector<8x32xf32>
    %31 = arith.mulf %22, %5 : vector<8x32xf32>
    %32 = arith.mulf %16, %24 : vector<8x32xf32>
    %33 = arith.addf %31, %32 : vector<8x32xf32>
    %34 = math.tanh %33 : vector<8x32xf32>
    %35 = arith.mulf %30, %34 : vector<8x32xf32>
    %c1_i32 = arith.constant 1 : i32
    %36 = arith.index_cast %c1_i32 : i32 to index
    %c0_12 = arith.constant 0 : index
    %c0_13 = arith.constant 0 : index
    %37 = vector.load %arg2[%36, %c0_12, %c0_13] : memref<8x8x128xf32, #tpu.memory_space<vmem>>, vector<1x8x128xf32>
    %38 = vector.shape_cast %37 : vector<1x8x128xf32> to vector<8x128xf32>
    %cst_14 = arith.constant dense<0.000000e+00> : vector<8x128xf32>
    %39 = tpu.matmul %35, %3, %cst_14 {dimension_numbers = #tpu.dot_dimension_numbers<[1], [0], [0], [1], [0, 0, 1, 1], [], []>} : vector<8x32xf32>, vector<32x128xf32>, vector<8x128xf32> -> vector<8x128xf32>
    %40 = arith.addf %38, %39 : vector<8x128xf32>
    %41 = vector.extract_strided_slice %40 {offsets = [0, 0], sizes = [8, 32], strides = [1, 1]} : vector<8x128xf32> to vector<8x32xf32>
    %42 = arith.negf %41 : vector<8x32xf32>
    %43 = math.exp %42 : vector<8x32xf32>
    %cst_15 = arith.constant 1.000000e+00 : f32
    %44 = vector.broadcast %cst_15 : f32 to vector<8x32xf32>
    %45 = arith.addf %44, %43 : vector<8x32xf32>
    %46 = arith.divf %44, %45 : vector<8x32xf32>
    %47 = vector.extract_strided_slice %40 {offsets = [0, 32], sizes = [8, 32], strides = [1, 1]} : vector<8x128xf32> to vector<8x32xf32>
    %48 = arith.negf %47 : vector<8x32xf32>
    %49 = math.exp %48 : vector<8x32xf32>
    %cst_16 = arith.constant 1.000000e+00 : f32
    %50 = vector.broadcast %cst_16 : f32 to vector<8x32xf32>
    %51 = arith.addf %50, %49 : vector<8x32xf32>
    %52 = arith.divf %50, %51 : vector<8x32xf32>
    %53 = vector.extract_strided_slice %40 {offsets = [0, 64], sizes = [8, 32], strides = [1, 1]} : vector<8x128xf32> to vector<8x32xf32>
    %54 = math.tanh %53 : vector<8x32xf32>
    %55 = vector.extract_strided_slice %40 {offsets = [0, 96], sizes = [8, 32], strides = [1, 1]} : vector<8x128xf32> to vector<8x32xf32>
    %56 = arith.negf %55 : vector<8x32xf32>
    %57 = math.exp %56 : vector<8x32xf32>
    %cst_17 = arith.constant 1.000000e+00 : f32
    %58 = vector.broadcast %cst_17 : f32 to vector<8x32xf32>
    %59 = arith.addf %58, %57 : vector<8x32xf32>
    %60 = arith.divf %58, %59 : vector<8x32xf32>
    %61 = arith.mulf %52, %33 : vector<8x32xf32>
    %62 = arith.mulf %46, %54 : vector<8x32xf32>
    %63 = arith.addf %61, %62 : vector<8x32xf32>
    %64 = math.tanh %63 : vector<8x32xf32>
    %65 = arith.mulf %60, %64 : vector<8x32xf32>
    %c2_i32 = arith.constant 2 : i32
    %66 = arith.index_cast %c2_i32 : i32 to index
    %c0_18 = arith.constant 0 : index
    %c0_19 = arith.constant 0 : index
    %67 = vector.load %arg2[%66, %c0_18, %c0_19] : memref<8x8x128xf32, #tpu.memory_space<vmem>>, vector<1x8x128xf32>
    %68 = vector.shape_cast %67 : vector<1x8x128xf32> to vector<8x128xf32>
    %cst_20 = arith.constant dense<0.000000e+00> : vector<8x128xf32>
    %69 = tpu.matmul %65, %3, %cst_20 {dimension_numbers = #tpu.dot_dimension_numbers<[1], [0], [0], [1], [0, 0, 1, 1], [], []>} : vector<8x32xf32>, vector<32x128xf32>, vector<8x128xf32> -> vector<8x128xf32>
    %70 = arith.addf %68, %69 : vector<8x128xf32>
    %71 = vector.extract_strided_slice %70 {offsets = [0, 0], sizes = [8, 32], strides = [1, 1]} : vector<8x128xf32> to vector<8x32xf32>
    %72 = arith.negf %71 : vector<8x32xf32>
    %73 = math.exp %72 : vector<8x32xf32>
    %cst_21 = arith.constant 1.000000e+00 : f32
    %74 = vector.broadcast %cst_21 : f32 to vector<8x32xf32>
    %75 = arith.addf %74, %73 : vector<8x32xf32>
    %76 = arith.divf %74, %75 : vector<8x32xf32>
    %77 = vector.extract_strided_slice %70 {offsets = [0, 32], sizes = [8, 32], strides = [1, 1]} : vector<8x128xf32> to vector<8x32xf32>
    %78 = arith.negf %77 : vector<8x32xf32>
    %79 = math.exp %78 : vector<8x32xf32>
    %cst_22 = arith.constant 1.000000e+00 : f32
    %80 = vector.broadcast %cst_22 : f32 to vector<8x32xf32>
    %81 = arith.addf %80, %79 : vector<8x32xf32>
    %82 = arith.divf %80, %81 : vector<8x32xf32>
    %83 = vector.extract_strided_slice %70 {offsets = [0, 64], sizes = [8, 32], strides = [1, 1]} : vector<8x128xf32> to vector<8x32xf32>
    %84 = math.tanh %83 : vector<8x32xf32>
    %85 = vector.extract_strided_slice %70 {offsets = [0, 96], sizes = [8, 32], strides = [1, 1]} : vector<8x128xf32> to vector<8x32xf32>
    %86 = arith.negf %85 : vector<8x32xf32>
    %87 = math.exp %86 : vector<8x32xf32>
    %cst_23 = arith.constant 1.000000e+00 : f32
    %88 = vector.broadcast %cst_23 : f32 to vector<8x32xf32>
    %89 = arith.addf %88, %87 : vector<8x32xf32>
    %90 = arith.divf %88, %89 : vector<8x32xf32>
    %91 = arith.mulf %82, %63 : vector<8x32xf32>
    %92 = arith.mulf %76, %84 : vector<8x32xf32>
    %93 = arith.addf %91, %92 : vector<8x32xf32>
    %94 = math.tanh %93 : vector<8x32xf32>
    %95 = arith.mulf %90, %94 : vector<8x32xf32>
    %c3_i32 = arith.constant 3 : i32
    %96 = arith.index_cast %c3_i32 : i32 to index
    %c0_24 = arith.constant 0 : index
    %c0_25 = arith.constant 0 : index
    %97 = vector.load %arg2[%96, %c0_24, %c0_25] : memref<8x8x128xf32, #tpu.memory_space<vmem>>, vector<1x8x128xf32>
    %98 = vector.shape_cast %97 : vector<1x8x128xf32> to vector<8x128xf32>
    %cst_26 = arith.constant dense<0.000000e+00> : vector<8x128xf32>
    %99 = tpu.matmul %95, %3, %cst_26 {dimension_numbers = #tpu.dot_dimension_numbers<[1], [0], [0], [1], [0, 0, 1, 1], [], []>} : vector<8x32xf32>, vector<32x128xf32>, vector<8x128xf32> -> vector<8x128xf32>
    %100 = arith.addf %98, %99 : vector<8x128xf32>
    %101 = vector.extract_strided_slice %100 {offsets = [0, 0], sizes = [8, 32], strides = [1, 1]} : vector<8x128xf32> to vector<8x32xf32>
    %102 = arith.negf %101 : vector<8x32xf32>
    %103 = math.exp %102 : vector<8x32xf32>
    %cst_27 = arith.constant 1.000000e+00 : f32
    %104 = vector.broadcast %cst_27 : f32 to vector<8x32xf32>
    %105 = arith.addf %104, %103 : vector<8x32xf32>
    %106 = arith.divf %104, %105 : vector<8x32xf32>
    %107 = vector.extract_strided_slice %100 {offsets = [0, 32], sizes = [8, 32], strides = [1, 1]} : vector<8x128xf32> to vector<8x32xf32>
    %108 = arith.negf %107 : vector<8x32xf32>
    %109 = math.exp %108 : vector<8x32xf32>
    %cst_28 = arith.constant 1.000000e+00 : f32
    %110 = vector.broadcast %cst_28 : f32 to vector<8x32xf32>
    %111 = arith.addf %110, %109 : vector<8x32xf32>
    %112 = arith.divf %110, %111 : vector<8x32xf32>
    %113 = vector.extract_strided_slice %100 {offsets = [0, 64], sizes = [8, 32], strides = [1, 1]} : vector<8x128xf32> to vector<8x32xf32>
    %114 = math.tanh %113 : vector<8x32xf32>
    %115 = vector.extract_strided_slice %100 {offsets = [0, 96], sizes = [8, 32], strides = [1, 1]} : vector<8x128xf32> to vector<8x32xf32>
    %116 = arith.negf %115 : vector<8x32xf32>
    %117 = math.exp %116 : vector<8x32xf32>
    %cst_29 = arith.constant 1.000000e+00 : f32
    %118 = vector.broadcast %cst_29 : f32 to vector<8x32xf32>
    %119 = arith.addf %118, %117 : vector<8x32xf32>
    %120 = arith.divf %118, %119 : vector<8x32xf32>
    %121 = arith.mulf %112, %93 : vector<8x32xf32>
    %122 = arith.mulf %106, %114 : vector<8x32xf32>
    %123 = arith.addf %121, %122 : vector<8x32xf32>
    %124 = math.tanh %123 : vector<8x32xf32>
    %125 = arith.mulf %120, %124 : vector<8x32xf32>
    %c4_i32 = arith.constant 4 : i32
    %126 = arith.index_cast %c4_i32 : i32 to index
    %c0_30 = arith.constant 0 : index
    %c0_31 = arith.constant 0 : index
    %127 = vector.load %arg2[%126, %c0_30, %c0_31] : memref<8x8x128xf32, #tpu.memory_space<vmem>>, vector<1x8x128xf32>
    %128 = vector.shape_cast %127 : vector<1x8x128xf32> to vector<8x128xf32>
    %cst_32 = arith.constant dense<0.000000e+00> : vector<8x128xf32>
    %129 = tpu.matmul %125, %3, %cst_32 {dimension_numbers = #tpu.dot_dimension_numbers<[1], [0], [0], [1], [0, 0, 1, 1], [], []>} : vector<8x32xf32>, vector<32x128xf32>, vector<8x128xf32> -> vector<8x128xf32>
    %130 = arith.addf %128, %129 : vector<8x128xf32>
    %131 = vector.extract_strided_slice %130 {offsets = [0, 0], sizes = [8, 32], strides = [1, 1]} : vector<8x128xf32> to vector<8x32xf32>
    %132 = arith.negf %131 : vector<8x32xf32>
    %133 = math.exp %132 : vector<8x32xf32>
    %cst_33 = arith.constant 1.000000e+00 : f32
    %134 = vector.broadcast %cst_33 : f32 to vector<8x32xf32>
    %135 = arith.addf %134, %133 : vector<8x32xf32>
    %136 = arith.divf %134, %135 : vector<8x32xf32>
    %137 = vector.extract_strided_slice %130 {offsets = [0, 32], sizes = [8, 32], strides = [1, 1]} : vector<8x128xf32> to vector<8x32xf32>
    %138 = arith.negf %137 : vector<8x32xf32>
    %139 = math.exp %138 : vector<8x32xf32>
    %cst_34 = arith.constant 1.000000e+00 : f32
    %140 = vector.broadcast %cst_34 : f32 to vector<8x32xf32>
    %141 = arith.addf %140, %139 : vector<8x32xf32>
    %142 = arith.divf %140, %141 : vector<8x32xf32>
    %143 = vector.extract_strided_slice %130 {offsets = [0, 64], sizes = [8, 32], strides = [1, 1]} : vector<8x128xf32> to vector<8x32xf32>
    %144 = math.tanh %143 : vector<8x32xf32>
    %145 = vector.extract_strided_slice %130 {offsets = [0, 96], sizes = [8, 32], strides = [1, 1]} : vector<8x128xf32> to vector<8x32xf32>
    %146 = arith.negf %145 : vector<8x32xf32>
    %147 = math.exp %146 : vector<8x32xf32>
    %cst_35 = arith.constant 1.000000e+00 : f32
    %148 = vector.broadcast %cst_35 : f32 to vector<8x32xf32>
    %149 = arith.addf %148, %147 : vector<8x32xf32>
    %150 = arith.divf %148, %149 : vector<8x32xf32>
    %151 = arith.mulf %142, %123 : vector<8x32xf32>
    %152 = arith.mulf %136, %144 : vector<8x32xf32>
    %153 = arith.addf %151, %152 : vector<8x32xf32>
    %154 = math.tanh %153 : vector<8x32xf32>
    %155 = arith.mulf %150, %154 : vector<8x32xf32>
    %c5_i32 = arith.constant 5 : i32
    %156 = arith.index_cast %c5_i32 : i32 to index
    %c0_36 = arith.constant 0 : index
    %c0_37 = arith.constant 0 : index
    %157 = vector.load %arg2[%156, %c0_36, %c0_37] : memref<8x8x128xf32, #tpu.memory_space<vmem>>, vector<1x8x128xf32>
    %158 = vector.shape_cast %157 : vector<1x8x128xf32> to vector<8x128xf32>
    %cst_38 = arith.constant dense<0.000000e+00> : vector<8x128xf32>
    %159 = tpu.matmul %155, %3, %cst_38 {dimension_numbers = #tpu.dot_dimension_numbers<[1], [0], [0], [1], [0, 0, 1, 1], [], []>} : vector<8x32xf32>, vector<32x128xf32>, vector<8x128xf32> -> vector<8x128xf32>
    %160 = arith.addf %158, %159 : vector<8x128xf32>
    %161 = vector.extract_strided_slice %160 {offsets = [0, 0], sizes = [8, 32], strides = [1, 1]} : vector<8x128xf32> to vector<8x32xf32>
    %162 = arith.negf %161 : vector<8x32xf32>
    %163 = math.exp %162 : vector<8x32xf32>
    %cst_39 = arith.constant 1.000000e+00 : f32
    %164 = vector.broadcast %cst_39 : f32 to vector<8x32xf32>
    %165 = arith.addf %164, %163 : vector<8x32xf32>
    %166 = arith.divf %164, %165 : vector<8x32xf32>
    %167 = vector.extract_strided_slice %160 {offsets = [0, 32], sizes = [8, 32], strides = [1, 1]} : vector<8x128xf32> to vector<8x32xf32>
    %168 = arith.negf %167 : vector<8x32xf32>
    %169 = math.exp %168 : vector<8x32xf32>
    %cst_40 = arith.constant 1.000000e+00 : f32
    %170 = vector.broadcast %cst_40 : f32 to vector<8x32xf32>
    %171 = arith.addf %170, %169 : vector<8x32xf32>
    %172 = arith.divf %170, %171 : vector<8x32xf32>
    %173 = vector.extract_strided_slice %160 {offsets = [0, 64], sizes = [8, 32], strides = [1, 1]} : vector<8x128xf32> to vector<8x32xf32>
    %174 = math.tanh %173 : vector<8x32xf32>
    %175 = vector.extract_strided_slice %160 {offsets = [0, 96], sizes = [8, 32], strides = [1, 1]} : vector<8x128xf32> to vector<8x32xf32>
    %176 = arith.negf %175 : vector<8x32xf32>
    %177 = math.exp %176 : vector<8x32xf32>
    %cst_41 = arith.constant 1.000000e+00 : f32
    %178 = vector.broadcast %cst_41 : f32 to vector<8x32xf32>
    %179 = arith.addf %178, %177 : vector<8x32xf32>
    %180 = arith.divf %178, %179 : vector<8x32xf32>
    %181 = arith.mulf %172, %153 : vector<8x32xf32>
    %182 = arith.mulf %166, %174 : vector<8x32xf32>
    %183 = arith.addf %181, %182 : vector<8x32xf32>
    %184 = math.tanh %183 : vector<8x32xf32>
    %185 = arith.mulf %180, %184 : vector<8x32xf32>
    %c6_i32 = arith.constant 6 : i32
    %186 = arith.index_cast %c6_i32 : i32 to index
    %c0_42 = arith.constant 0 : index
    %c0_43 = arith.constant 0 : index
    %187 = vector.load %arg2[%186, %c0_42, %c0_43] : memref<8x8x128xf32, #tpu.memory_space<vmem>>, vector<1x8x128xf32>
    %188 = vector.shape_cast %187 : vector<1x8x128xf32> to vector<8x128xf32>
    %cst_44 = arith.constant dense<0.000000e+00> : vector<8x128xf32>
    %189 = tpu.matmul %185, %3, %cst_44 {dimension_numbers = #tpu.dot_dimension_numbers<[1], [0], [0], [1], [0, 0, 1, 1], [], []>} : vector<8x32xf32>, vector<32x128xf32>, vector<8x128xf32> -> vector<8x128xf32>
    %190 = arith.addf %188, %189 : vector<8x128xf32>
    %191 = vector.extract_strided_slice %190 {offsets = [0, 0], sizes = [8, 32], strides = [1, 1]} : vector<8x128xf32> to vector<8x32xf32>
    %192 = arith.negf %191 : vector<8x32xf32>
    %193 = math.exp %192 : vector<8x32xf32>
    %cst_45 = arith.constant 1.000000e+00 : f32
    %194 = vector.broadcast %cst_45 : f32 to vector<8x32xf32>
    %195 = arith.addf %194, %193 : vector<8x32xf32>
    %196 = arith.divf %194, %195 : vector<8x32xf32>
    %197 = vector.extract_strided_slice %190 {offsets = [0, 32], sizes = [8, 32], strides = [1, 1]} : vector<8x128xf32> to vector<8x32xf32>
    %198 = arith.negf %197 : vector<8x32xf32>
    %199 = math.exp %198 : vector<8x32xf32>
    %cst_46 = arith.constant 1.000000e+00 : f32
    %200 = vector.broadcast %cst_46 : f32 to vector<8x32xf32>
    %201 = arith.addf %200, %199 : vector<8x32xf32>
    %202 = arith.divf %200, %201 : vector<8x32xf32>
    %203 = vector.extract_strided_slice %190 {offsets = [0, 64], sizes = [8, 32], strides = [1, 1]} : vector<8x128xf32> to vector<8x32xf32>
    %204 = math.tanh %203 : vector<8x32xf32>
    %205 = vector.extract_strided_slice %190 {offsets = [0, 96], sizes = [8, 32], strides = [1, 1]} : vector<8x128xf32> to vector<8x32xf32>
    %206 = arith.negf %205 : vector<8x32xf32>
    %207 = math.exp %206 : vector<8x32xf32>
    %cst_47 = arith.constant 1.000000e+00 : f32
    %208 = vector.broadcast %cst_47 : f32 to vector<8x32xf32>
    %209 = arith.addf %208, %207 : vector<8x32xf32>
    %210 = arith.divf %208, %209 : vector<8x32xf32>
    %211 = arith.mulf %202, %183 : vector<8x32xf32>
    %212 = arith.mulf %196, %204 : vector<8x32xf32>
    %213 = arith.addf %211, %212 : vector<8x32xf32>
    %214 = math.tanh %213 : vector<8x32xf32>
    %215 = arith.mulf %210, %214 : vector<8x32xf32>
    %c7_i32 = arith.constant 7 : i32
    %216 = arith.index_cast %c7_i32 : i32 to index
    %c0_48 = arith.constant 0 : index
    %c0_49 = arith.constant 0 : index
    %217 = vector.load %arg2[%216, %c0_48, %c0_49] : memref<8x8x128xf32, #tpu.memory_space<vmem>>, vector<1x8x128xf32>
    %218 = vector.shape_cast %217 : vector<1x8x128xf32> to vector<8x128xf32>
    %cst_50 = arith.constant dense<0.000000e+00> : vector<8x128xf32>
    %219 = tpu.matmul %215, %3, %cst_50 {dimension_numbers = #tpu.dot_dimension_numbers<[1], [0], [0], [1], [0, 0, 1, 1], [], []>} : vector<8x32xf32>, vector<32x128xf32>, vector<8x128xf32> -> vector<8x128xf32>
    %220 = arith.addf %218, %219 : vector<8x128xf32>
    %221 = vector.extract_strided_slice %220 {offsets = [0, 0], sizes = [8, 32], strides = [1, 1]} : vector<8x128xf32> to vector<8x32xf32>
    %222 = arith.negf %221 : vector<8x32xf32>
    %223 = math.exp %222 : vector<8x32xf32>
    %cst_51 = arith.constant 1.000000e+00 : f32
    %224 = vector.broadcast %cst_51 : f32 to vector<8x32xf32>
    %225 = arith.addf %224, %223 : vector<8x32xf32>
    %226 = arith.divf %224, %225 : vector<8x32xf32>
    %227 = vector.extract_strided_slice %220 {offsets = [0, 32], sizes = [8, 32], strides = [1, 1]} : vector<8x128xf32> to vector<8x32xf32>
    %228 = arith.negf %227 : vector<8x32xf32>
    %229 = math.exp %228 : vector<8x32xf32>
    %cst_52 = arith.constant 1.000000e+00 : f32
    %230 = vector.broadcast %cst_52 : f32 to vector<8x32xf32>
    %231 = arith.addf %230, %229 : vector<8x32xf32>
    %232 = arith.divf %230, %231 : vector<8x32xf32>
    %233 = vector.extract_strided_slice %220 {offsets = [0, 64], sizes = [8, 32], strides = [1, 1]} : vector<8x128xf32> to vector<8x32xf32>
    %234 = math.tanh %233 : vector<8x32xf32>
    %235 = vector.extract_strided_slice %220 {offsets = [0, 96], sizes = [8, 32], strides = [1, 1]} : vector<8x128xf32> to vector<8x32xf32>
    %236 = arith.negf %235 : vector<8x32xf32>
    %237 = math.exp %236 : vector<8x32xf32>
    %cst_53 = arith.constant 1.000000e+00 : f32
    %238 = vector.broadcast %cst_53 : f32 to vector<8x32xf32>
    %239 = arith.addf %238, %237 : vector<8x32xf32>
    %240 = arith.divf %238, %239 : vector<8x32xf32>
    %241 = arith.mulf %232, %213 : vector<8x32xf32>
    %242 = arith.mulf %226, %234 : vector<8x32xf32>
    %243 = arith.addf %241, %242 : vector<8x32xf32>
    %244 = math.tanh %243 : vector<8x32xf32>
    %245 = arith.mulf %240, %244 : vector<8x32xf32>
    %c8_i32 = arith.constant 8 : i32
    %c0_54 = arith.constant 0 : index
    %c0_55 = arith.constant 0 : index
    %246 = vector.load %arg7[%c0_54, %c0_55] : memref<8x32xf32, #tpu.memory_space<vmem>>, vector<8x32xf32>
    tpu.vector_store %arg7[%c0_54, %c0_55], %245 {strides = array<i32>} : memref<8x32xf32, #tpu.memory_space<vmem>>, vector<8x32xf32>,
    %c0_56 = arith.constant 0 : index
    %c0_57 = arith.constant 0 : index
    %247 = vector.load %arg8[%c0_56, %c0_57] : memref<8x32xf32, #tpu.memory_space<vmem>>, vector<8x32xf32>
    tpu.vector_store %arg8[%c0_56, %c0_57], %243 {strides = array<i32>} : memref<8x32xf32, #tpu.memory_space<vmem>>, vector<8x32xf32>,
    %c0_i32_58 = arith.constant 0 : i32
    %248 = arith.cmpi eq, %arg1, %c0_i32_58 : i32
    %249 = arith.extui %248 : i1 to i32
    %c0_i32_59 = arith.constant 0 : i32
    %250 = arith.cmpi ne, %249, %c0_i32_59 : i32
    scf.if %250 {
      %c0_60 = arith.constant 0 : index
      %c0_61 = arith.constant 0 : index
      %251 = vector.load %arg4[%c0_60, %c0_61] : memref<32x128xf32, #tpu.memory_space<vmem>>, vector<32x128xf32>
      %cst_62 = arith.constant dense<0.000000e+00> : vector<8x128xf32>
      %252 = tpu.matmul %245, %251, %cst_62 {dimension_numbers = #tpu.dot_dimension_numbers<[1], [0], [0], [1], [0, 0, 1, 1], [], []>} : vector<8x32xf32>, vector<32x128xf32>, vector<8x128xf32> -> vector<8x128xf32>
      %c0_63 = arith.constant 0 : index
      %c0_64 = arith.constant 0 : index
      %253 = vector.load %arg5[%c0_63, %c0_64] : memref<1x128xf32, #tpu.memory_space<vmem>>, vector<1x128xf32>
      %254 = vector.broadcast %253 : vector<1x128xf32> to vector<8x128xf32>
      %255 = arith.addf %252, %254 : vector<8x128xf32>
      %c0_65 = arith.constant 0 : index
      %c0_66 = arith.constant 0 : index
      %256 = vector.load %arg6[%c0_65, %c0_66] : memref<8x128xf32, #tpu.memory_space<vmem>>, vector<8x128xf32>
      tpu.vector_store %arg6[%c0_65, %c0_66], %255 {strides = array<i32>} : memref<8x128xf32, #tpu.memory_space<vmem>>, vector<8x128xf32>,
    } else {
    }
    return
  }
  func.func @transform_0(%arg0: i32, %arg1: i32) -> (i32, i32, i32) {
    %c0_i32 = arith.constant 0 : i32
    %c0_i32_0 = arith.constant 0 : i32
    return %arg1, %arg0, %c0_i32 : i32, i32, i32
  }
  func.func @transform_1(%arg0: i32, %arg1: i32) -> (i32, i32) {
    %c0_i32 = arith.constant 0 : i32
    %c0_i32_0 = arith.constant 0 : i32
    %c0_i32_1 = arith.constant 0 : i32
    return %c0_i32, %c0_i32_0 : i32, i32
  }
  func.func @transform_2(%arg0: i32, %arg1: i32) -> (i32, i32) {
    %c0_i32 = arith.constant 0 : i32
    %c0_i32_0 = arith.constant 0 : i32
    %c0_i32_1 = arith.constant 0 : i32
    return %c0_i32, %c0_i32_0 : i32, i32
  }
  func.func @transform_3(%arg0: i32, %arg1: i32) -> (i32, i32) {
    %c0_i32 = arith.constant 0 : i32
    %c0_i32_0 = arith.constant 0 : i32
    %c0_i32_1 = arith.constant 0 : i32
    return %c0_i32, %c0_i32_0 : i32, i32
  }
  func.func @transform_4(%arg0: i32, %arg1: i32) -> (i32, i32) {
    %c0_i32 = arith.constant 0 : i32
    %c0_i32_0 = arith.constant 0 : i32
    return %arg0, %c0_i32 : i32, i32
  }
}

</mosaic_0001>

<bundles_post_ra>
// kernel: tpu_custom_call.1
= control target key start
LH: loop header
LB: loop body
LE: loop exit
PB: predicated region body
PF: predicated region fallthrough
CT: control target
= control target key end

     0   :  { %9 = vsyncpa [#allocation5], 0  ;;  %s1597_s0 = inlined_call_operand.hbm [shape: f32[8,8,128], index: 0, kind: input, shape index: {}]   ;;  %s1598_s1 = inlined_call_operand.hbm [shape: f32[32,128], index: 1, kind: input, shape index: {}]   ;;  %s1599_s2 = inlined_call_operand.hbm [shape: f32[32,128], index: 2, kind: input, shape index: {}]   ;;  %s1600_s3 = inlined_call_operand.vmem [shape: f32[1,128], index: 3, kind: input, shape index: {}]   ;;  %s1601_s4 = inlined_call_operand.hbm [shape: f32[8,128], index: 4, kind: output, shape index: {}]  }
   0x1   :  { %10 = vsyncpa [#allocation8], 0 }
   0x2   :  { %11 = vsyncpa [#allocation6], 0  ;;  %s1389_s15 = smov [#allocation7]   ;;  %s1390_s17 = smov [#allocation4]  }
   0x3   :  { %s29_s16 = sshll.u32 %s1389_s15, 4  ;;  %s17_s18 = sshll.u32 %s1390_s17, 4  ;;  %s30_s16 = int_to_ptr.vmem [resolvable:$true] %s29_s16  ;;  %s1426_s18 = int_to_ptr.vmem [resolvable:$true] %s17_s18 }
   0x4   :  { %s1295_s21 = scalar_lea.hbm %s1598_s1, 512 }
   0x5   :  { %p1296_p0 = scmp.ne.s32.totalorder %s1598_s1, %s1295_s21  ;;  %p1299_p1 = scmp.lt.u32.totalorder %s1295_s21, %s1598_s1 }
   0x7   :  { %p1301_p2 = pnand %p1299_p1, %p1296_p0 }
   0x9   :  { %1304 = shalt.err (!%p1301_p2)
}
   0xa   :  { %s1305_s26 = scalar_lea.vmem %s30_s16, 512  ;;  %p1310_p4 = scmp.lt.s32.totalorder %s30_s16, %s30_s16 }
   0xb   :  { %p1306_p3 = scmp.ne.s32.totalorder %s30_s16, %s1305_s26  ;;  %p1311_p5 = scmp.lt.s32.totalorder %s1305_s26, %s1305_s26 }
   0xd   :  { %p1312_p6 = por %p1311_p5, %p1310_p4 }
   0xf   :  { %p1313_p7 = pnand %p1312_p6, %p1306_p3 }
  0x11   :  { %1316 = shalt.err (!%p1313_p7)
}
  0x12   :  { %s1391_s27 = smov 128   ;;  %s1392_s28 = smov 8  }
  0x13   :  { %35 = dma.hbm_to_vmem [thread:$0]  %s1598_s1, 512, %s30_s16, [#allocation8], %s1391_s27, %s1391_s27, %s1392_s28  }
  0x14   :  { %s1317_s7 = scalar_lea.hbm %s1597_s0, 1024 }
  0x15   :  { %p1318_p8 = scmp.ne.s32.totalorder %s1597_s0, %s1317_s7  ;;  %p1321_p9 = scmp.lt.u32.totalorder %s1317_s7, %s1597_s0 }
  0x17   :  { %p1323_p10 = pnand %p1321_p9, %p1318_p8 }
  0x19   :  { %1326 = shalt.err (!%p1323_p10)
}
  0x1a   :  { %s1327_s12 = scalar_lea.vmem %s1426_s18, 1024  ;;  %p1332_p12 = scmp.lt.s32.totalorder %s1426_s18, %s1426_s18 }
  0x1b   :  { %p1328_p11 = scmp.ne.s32.totalorder %s1426_s18, %s1327_s12  ;;  %p1333_p13 = scmp.lt.s32.totalorder %s1327_s12, %s1327_s12 }
  0x1d   :  { %p1334_p0 = por %p1333_p13, %p1332_p12 }
  0x1f   :  { %p1335_p1 = pnand %p1334_p0, %p1328_p11 }
  0x21   :  { %1338 = shalt.err (!%p1335_p1)
}
  0x22   :  { %23 = dma.hbm_to_vmem [thread:$0]  %s1597_s0, 1024, %s1426_s18, [#allocation5], %s1391_s27, %s1391_s27, %s1392_s28  }
  0x23   :  { %s1393_s14 = smov [#allocation9]   ;;  %s1339_s19 = scalar_lea.hbm %s1599_s2, 512 }
  0x24   :  { %s41_s15 = sshll.u32 %s1393_s14, 4  ;;  %p1340_p2 = scmp.ne.s32.totalorder %s1599_s2, %s1339_s19  ;;  %s42_s15 = int_to_ptr.vmem [resolvable:$true] %s41_s15 }
  0x25   :  { %p1343_p3 = scmp.lt.u32.totalorder %s1339_s19, %s1599_s2 }
  0x27   :  { %p1345_p4 = pnand %p1343_p3, %p1340_p2 }
  0x29   :  { %1348 = shalt.err (!%p1345_p4)
}
  0x2a   :  { %s1349_s24 = scalar_lea.vmem %s42_s15, 512  ;;  %p1354_p6 = scmp.lt.s32.totalorder %s42_s15, %s42_s15 }
  0x2b   :  { %p1350_p5 = scmp.ne.s32.totalorder %s42_s15, %s1349_s24  ;;  %p1355_p7 = scmp.lt.s32.totalorder %s1349_s24, %s1349_s24 }
  0x2d   :  { %p1356_p8 = por %p1355_p7, %p1354_p6 }
  0x2f   :  { %p1357_p9 = pnand %p1356_p8, %p1350_p5 }
  0x31   :  { %1360 = shalt.err (!%p1357_p9)
}
  0x32   :  { %47 = dma.hbm_to_vmem [thread:$0]  %s1599_s2, 512, %s42_s15, [#allocation8], %s1391_s27, %s1391_s27, %s1392_s28  }
  0x33   :  { %1383 = dma.done.wait [#allocation5], 1024  }
  0x34   :  { %1384 = vsyncadd [#allocation5], 4294966272 }
  0x35   :  { %1385 = dma.done.wait [#allocation8], 1024  }
  0x36   :  { %1386 = vsyncadd [#allocation8], 4294966272  ;;  %vm63_vm0 = vcmask 261120   ;;  %v1394_v0 = vmov 0.0|0.0   ;;  %vm1395_vm1 = vmmov 0   ;;  %v1396_v1 = vmov 0.0  }
  0x37   :  { %1165 = vmatprep.subr.bf16.mxu0 %v1394_v0  ;;  %1074 = vmatprep.mubr.msk.f32.mxu0 %vm1395_vm1, %v1396_v1  ;;  %64 = vst.msk [vmem:[#allocation2] sm:$0xff] %vm63_vm0, %v1396_v1  ;;  %65 = vst.msk [vmem:[#allocation3] sm:$0xff] %vm63_vm0, %v1396_v1  ;;  %v66_v2 = vld [vmem:[#allocation7] sm:$0xff]  ;;  %v67_v3 = vld [vmem:[#allocation7 + $0x8] sm:$0xff]  ;;  %s1397_s2 = smov 64   ;;  %s1398_s25 = smov 32  }
  0x38   :  { %1171 = vmatprep.subr.bf16.mxu1 %v1394_v0  ;;  %1085 = vmatprep.mubr.msk.f32.mxu1 %vm1395_vm1, %v1396_v1  ;;  %v68_v4 = vld [vmem:[#allocation7 + $0x10] sm:$0xff]  ;;  %v1488_v5 = vpack.c.bf16 %v67_v3, %v66_v2  ;;  %v69_v6 = vld [vmem:[#allocation7 + $0x18] sm:$0xff]  ;;  %v72_v9 = vld [vmem:[#allocation4] sm:$0xff]  ;;  %s1399_s26 = smov 96   ;;  %s1400_s29 = smov [#allocation10]  }
  0x39   :  { %v1491_v7 = vpack.c.bf16 %v69_v6, %v68_v4  ;;  %v177_v29 = vld [vmem:[#allocation4 + $0x8] sm:$0xff]  ;;  %v279_v47 = vld [vmem:[#allocation4 + $0x10] sm:$0xff]  ;;  %v381_v3 = vld [vmem:[#allocation4 + $0x18] sm:$0xff]  ;;  %s993_s30 = sshll.u32 %s1400_s29, 4  ;;  %s994_s30 = int_to_ptr.vmem [resolvable:$true] %s993_s30 }
  0x3a   :  { %1167 = vmatpush3.bf16.msra.mxu0 %v1488_v5  ;;  %1173 = vmatpush3.bf16.msra.mxu1 %v1488_v5  ;;  %s1361_s5 = scalar_lea.vmem %s994_s30, 128  ;;  %p1366_p11 = scmp.lt.s32.totalorder %s994_s30, %s994_s30 }
  0x3b   :  { %1168 = vmatprep.subr.bf16.mxu0 %v1394_v0  ;;  %1174 = vmatprep.subr.bf16.mxu1 %v1394_v0  ;;  %p1362_p10 = scmp.ne.s32.totalorder %s994_s30, %s1361_s5  ;;  %p1367_p12 = scmp.lt.s32.totalorder %s1361_s5, %s1361_s5 }
  0x3d   :  { %p1368_p13 = por %p1367_p12, %p1366_p11 }
  0x3e   :  { %1170 = vmatpush3.bf16.msra.mxu0 %v1491_v7  ;;  %v70_v8 = vld [vmem:[#allocation2] sm:$0xff]  ;;  %1176 = vmatpush3.bf16.msra.mxu1 %v1491_v7  ;;  %v71_v14 = vld [vmem:[#allocation3] sm:$0xff] }
  0x3f   :  { %1177 = vmatprep.subr.bf16.mxu0 %v1394_v0  ;;  %1183 = vmatprep.subr.bf16.mxu1 %v1394_v0  ;;  %p1369_p0 = pnand %p1368_p13, %p1362_p10 }
  0x41   :  { %1075 = vmatmul.mubr.msk.f32.vlgmr.msra.gmra.mrb[0].mxu0 %vm63_vm0, %v70_v8 }
  0x42   :  { %1179 = vmatpush3.bf16.msra.mxu0 %v1488_v5  ;;  %1096 = vmatprep.mubr.msk.f32.mxu0 %vm1395_vm1, %v1396_v1 }
  0x43   :  { %1180 = vmatprep.subr.bf16.mxu0 %v1394_v0 }
  0x46   :  { %1182 = vmatpush3.bf16.msra.mxu0 %v1491_v7 }
  0x47   :  { %1189 = vmatprep.subr.bf16.mxu0 %v1394_v0 }
 0x114   :  { %v143_v10 = vpop.f32.mrb[0].mxu0 }
 0x115   :  { %v147_v11 = vadd.f32 %v143_v10, %v72_v9  ;;  %v1076_v12 = vpop.f32.mrb[1].mxu0 }
 0x117   :  { %1231 = vtanh.f32 %v147_v11  ;;  %v1004_v15 = vmul.f32 -1.442695, %v147_v11 }
 0x119   :  { %1233 = vpow2.f32 %v1004_v15 }
 0x121   :  { %v1232_v13 = vpop.eup %1231 }
 0x122   :  { %161 = vrot.lane.b32.xlu0 %v1232_v13, %s1397_s2 }
 0x123   :  { %v1234_v16 = vpop.eup %1233 }
 0x124   :  { %v151_v17 = vadd.f32 1.0, %v1234_v16 }
 0x126   :  { %156 = vrot.lane.b32.xlu0 %v71_v14, %s1398_s25  ;;  %1235 = vrcp.f32 %v151_v17 }
 0x130   :  { %v1236_v18 = vpop.eup %1235 }
 0x194   :  { %v162_v19 = vpop.permute.xlu0 %161 }
 0x195   :  { %v164_v20 = vmul.f32 %v1236_v18, %v162_v19 }
 0x197   :  { %166 = vrot.lane.b32.xlu1 %v164_v20, %s1398_s25 }
 0x198   :  { %v157_v21 = vpop.permute.xlu0 %156 }
 0x199   :  { %v159_v22 = vmul.f32 %v1236_v18, %v157_v21 }
 0x209   :  { %v167_v23 = vpop.permute.xlu1 %166 }
 0x20a   :  { %v169_v24 = vadd.f32 %v167_v23, %v159_v22  ;;  %v483_v23 = vld [vmem:[#allocation4 + $0x20] sm:$0xff] }
 0x20c   :  { %1237 = vtanh.f32 %v169_v24 }
 0x216   :  { %v1238_v25 = vpop.eup %1237 }
 0x217   :  { %172 = vrot.lane.b32.xlu1 %v1238_v25, %s1397_s2 }
 0x289   :  { %v173_v26 = vpop.permute.xlu1 %172 }
 0x28a   :  { %v175_v27 = vmul.f32 %v1236_v18, %v173_v26 }
 0x28c   :  { %179 = vrot.lane.b32.xlu0 %v175_v27, %s1398_s25 }
 0x2fe   :  { %v180_v28 = vpop.permute.xlu0 %179 }
 0x2ff   :  { %1086 = vmatmul.mubr.msk.f32.vlgmr.msra.gmra.mrb[0].mxu1 %vm63_vm0, %v180_v28 }
 0x300   :  { %1185 = vmatpush3.bf16.msra.mxu1 %v1488_v5  ;;  %1107 = vmatprep.mubr.msk.f32.mxu1 %vm1395_vm1, %v1396_v1 }
 0x301   :  { %1186 = vmatprep.subr.bf16.mxu1 %v1394_v0 }
 0x304   :  { %1188 = vmatpush3.bf16.msra.mxu1 %v1491_v7 }
 0x305   :  { %1195 = vmatprep.subr.bf16.mxu1 %v1394_v0 }
 0x3d2   :  { %v249_v30 = vpop.f32.mrb[0].mxu1 }
 0x3d3   :  { %v253_v31 = vadd.f32 %v249_v30, %v177_v29  ;;  %v1087_v32 = vpop.f32.mrb[1].mxu1 }
 0x3d5   :  { %1239 = vtanh.f32 %v253_v31  ;;  %v1006_v34 = vmul.f32 -1.442695, %v253_v31 }
 0x3d7   :  { %1241 = vpow2.f32 %v1006_v34 }
 0x3df   :  { %v1240_v33 = vpop.eup %1239 }
 0x3e0   :  { %263 = vrot.lane.b32.xlu1 %v1240_v33, %s1397_s2 }
 0x3e1   :  { %v1242_v35 = vpop.eup %1241 }
 0x3e2   :  { %v257_v36 = vadd.f32 1.0, %v1242_v35 }
 0x3e4   :  { %1243 = vrcp.f32 %v257_v36 }
 0x3ee   :  { %v1244_v37 = vpop.eup %1243 }
 0x3ef   :  { %v261_v40 = vmul.f32 %v1244_v37, %v169_v24 }
 0x452   :  { %v264_v38 = vpop.permute.xlu1 %263 }
 0x453   :  { %v266_v39 = vmul.f32 %v1244_v37, %v264_v38 }
 0x455   :  { %268 = vrot.lane.b32.xlu0 %v266_v39, %s1398_s25 }
 0x4c7   :  { %v269_v41 = vpop.permute.xlu0 %268 }
 0x4c8   :  { %v271_v42 = vadd.f32 %v269_v41, %v261_v40  ;;  %v585_v41 = vld [vmem:[#allocation4 + $0x28] sm:$0xff] }
 0x4ca   :  { %1245 = vtanh.f32 %v271_v42 }
 0x4d4   :  { %v1246_v43 = vpop.eup %1245 }
 0x4d5   :  { %274 = vrot.lane.b32.xlu1 %v1246_v43, %s1397_s2 }
 0x547   :  { %v275_v44 = vpop.permute.xlu1 %274 }
 0x548   :  { %v277_v45 = vmul.f32 %v1244_v37, %v275_v44 }
 0x54a   :  { %281 = vrot.lane.b32.xlu0 %v277_v45, %s1398_s25 }
 0x5bc   :  { %v282_v46 = vpop.permute.xlu0 %281 }
 0x5bd   :  { %1097 = vmatmul.mubr.msk.f32.vlgmr.msra.gmra.mrb[2].mxu0 %vm63_vm0, %v282_v46 }
 0x5be   :  { %1191 = vmatpush3.bf16.msra.mxu0 %v1488_v5  ;;  %1118 = vmatprep.mubr.msk.f32.mxu0 %vm1395_vm1, %v1396_v1 }
 0x5bf   :  { %1192 = vmatprep.subr.bf16.mxu0 %v1394_v0 }
 0x5c2   :  { %1194 = vmatpush3.bf16.msra.mxu0 %v1491_v7 }
 0x5c3   :  { %1201 = vmatprep.subr.bf16.mxu0 %v1394_v0 }
 0x690   :  { %v351_v48 = vpop.f32.mrb[2].mxu0 }
 0x691   :  { %v355_v49 = vadd.f32 %v351_v48, %v279_v47  ;;  %v1098_v50 = vpop.f32.mrb[3].mxu0 }
 0x693   :  { %1247 = vtanh.f32 %v355_v49  ;;  %v1008_v52 = vmul.f32 -1.442695, %v355_v49 }
 0x695   :  { %1249 = vpow2.f32 %v1008_v52 }
 0x69d   :  { %v1248_v51 = vpop.eup %1247 }
 0x69e   :  { %365 = vrot.lane.b32.xlu1 %v1248_v51, %s1397_s2 }
 0x69f   :  { %v1250_v53 = vpop.eup %1249 }
 0x6a0   :  { %v359_v54 = vadd.f32 1.0, %v1250_v53 }
 0x6a2   :  { %1251 = vrcp.f32 %v359_v54 }
 0x6ac   :  { %v1252_v55 = vpop.eup %1251 }
 0x6ad   :  { %v363_v58 = vmul.f32 %v1252_v55, %v271_v42 }
 0x710   :  { %v366_v56 = vpop.permute.xlu1 %365 }
 0x711   :  { %v368_v57 = vmul.f32 %v1252_v55, %v366_v56 }
 0x713   :  { %370 = vrot.lane.b32.xlu0 %v368_v57, %s1398_s25  ;;  %v687_v57 = vld [vmem:[#allocation4 + $0x30] sm:$0xff] }
 0x785   :  { %v371_v59 = vpop.permute.xlu0 %370 }
 0x786   :  { %v373_v60 = vadd.f32 %v371_v59, %v363_v58 }
 0x788   :  { %1253 = vtanh.f32 %v373_v60 }
 0x792   :  { %v1254_v61 = vpop.eup %1253 }
 0x793   :  { %376 = vrot.lane.b32.xlu1 %v1254_v61, %s1397_s2 }
 0x805   :  { %v377_v62 = vpop.permute.xlu1 %376 }
 0x806   :  { %v379_v63 = vmul.f32 %v1252_v55, %v377_v62 }
 0x808   :  { %383 = vrot.lane.b32.xlu0 %v379_v63, %s1398_s25 }
 0x87a   :  { %v384_v2 = vpop.permute.xlu0 %383 }
 0x87b   :  { %1108 = vmatmul.mubr.msk.f32.vlgmr.msra.gmra.mrb[2].mxu1 %vm63_vm0, %v384_v2 }
 0x87c   :  { %1197 = vmatpush3.bf16.msra.mxu1 %v1488_v5  ;;  %1129 = vmatprep.mubr.msk.f32.mxu1 %vm1395_vm1, %v1396_v1 }
 0x87d   :  { %1198 = vmatprep.subr.bf16.mxu1 %v1394_v0 }
 0x880   :  { %1200 = vmatpush3.bf16.msra.mxu1 %v1491_v7 }
 0x881   :  { %1207 = vmatprep.subr.bf16.mxu1 %v1394_v0 }
 0x94e   :  { %v453_v4 = vpop.f32.mrb[2].mxu1 }
 0x94f   :  { %v457_v6 = vadd.f32 %v453_v4, %v381_v3  ;;  %v1109_v8 = vpop.f32.mrb[3].mxu1 }
 0x951   :  { %1255 = vtanh.f32 %v457_v6  ;;  %v1010_v10 = vmul.f32 -1.442695, %v457_v6 }
 0x953   :  { %1257 = vpow2.f32 %v1010_v10 }
 0x95b   :  { %v1256_v9 = vpop.eup %1255 }
 0x95c   :  { %467 = vrot.lane.b32.xlu1 %v1256_v9, %s1397_s2 }
 0x95d   :  { %v1258_v11 = vpop.eup %1257 }
 0x95e   :  { %v461_v12 = vadd.f32 1.0, %v1258_v11 }
 0x960   :  { %1259 = vrcp.f32 %v461_v12 }
 0x96a   :  { %v1260_v13 = vpop.eup %1259 }
 0x96b   :  { %v465_v16 = vmul.f32 %v1260_v13, %v373_v60 }
 0x9ce   :  { %v468_v14 = vpop.permute.xlu1 %467 }
 0x9cf   :  { %v470_v15 = vmul.f32 %v1260_v13, %v468_v14  ;;  %v789_v14 = vld [vmem:[#allocation4 + $0x38] sm:$0xff] }
 0x9d1   :  { %472 = vrot.lane.b32.xlu0 %v470_v15, %s1398_s25 }
 0xa43   :  { %v473_v17 = vpop.permute.xlu0 %472 }
 0xa44   :  { %v475_v18 = vadd.f32 %v473_v17, %v465_v16 }
 0xa46   :  { %1261 = vtanh.f32 %v475_v18 }
 0xa50   :  { %v1262_v19 = vpop.eup %1261 }
 0xa51   :  { %478 = vrot.lane.b32.xlu1 %v1262_v19, %s1397_s2 }
 0xac3   :  { %v479_v20 = vpop.permute.xlu1 %478 }
 0xac4   :  { %v481_v21 = vmul.f32 %v1260_v13, %v479_v20 }
 0xac6   :  { %485 = vrot.lane.b32.xlu0 %v481_v21, %s1398_s25 }
 0xb38   :  { %v486_v22 = vpop.permute.xlu0 %485 }
 0xb39   :  { %1119 = vmatmul.mubr.msk.f32.vlgmr.msra.gmra.mrb[4].mxu0 %vm63_vm0, %v486_v22 }
 0xb3a   :  { %1203 = vmatpush3.bf16.msra.mxu0 %v1488_v5  ;;  %1140 = vmatprep.mubr.msk.f32.mxu0 %vm1395_vm1, %v1396_v1 }
 0xb3b   :  { %1204 = vmatprep.subr.bf16.mxu0 %v1394_v0 }
 0xb3e   :  { %1206 = vmatpush3.bf16.msra.mxu0 %v1491_v7 }
 0xb3f   :  { %1213 = vmatprep.subr.bf16.mxu0 %v1394_v0 }
 0xc0c   :  { %v555_v24 = vpop.f32.mrb[4].mxu0 }
 0xc0d   :  { %v559_v25 = vadd.f32 %v555_v24, %v483_v23  ;;  %v1120_v26 = vpop.f32.mrb[5].mxu0 }
 0xc0f   :  { %1263 = vtanh.f32 %v559_v25  ;;  %v1012_v28 = vmul.f32 -1.442695, %v559_v25 }
 0xc11   :  { %1265 = vpow2.f32 %v1012_v28  ;;  %v903_v28 = vld [vmem:[#allocation9] sm:$0xff] }
 0xc19   :  { %v1264_v27 = vpop.eup %1263 }
 0xc1a   :  { %569 = vrot.lane.b32.xlu1 %v1264_v27, %s1397_s2 }
 0xc1b   :  { %v1266_v29 = vpop.eup %1265 }
 0xc1c   :  { %v563_v30 = vadd.f32 1.0, %v1266_v29  ;;  %v904_v29 = vld [vmem:[#allocation9 + $0x8] sm:$0xff] }
 0xc1e   :  { %1267 = vrcp.f32 %v563_v30  ;;  %v905_v30 = vld [vmem:[#allocation9 + $0x10] sm:$0xff] }
 0xc28   :  { %v1268_v31 = vpop.eup %1267 }
 0xc29   :  { %v567_v34 = vmul.f32 %v1268_v31, %v475_v18 }
 0xc8c   :  { %v570_v32 = vpop.permute.xlu1 %569 }
 0xc8d   :  { %v572_v33 = vmul.f32 %v1268_v31, %v570_v32  ;;  %v906_v32 = vld [vmem:[#allocation9 + $0x18] sm:$0xff] }
 0xc8f   :  { %574 = vrot.lane.b32.xlu0 %v572_v33, %s1398_s25  ;;  %v1217_v33 = vpack.c.bf16 %v906_v32, %v905_v30 }
 0xd01   :  { %v575_v35 = vpop.permute.xlu0 %574 }
 0xd02   :  { %v577_v36 = vadd.f32 %v575_v35, %v567_v34 }
 0xd04   :  { %1269 = vtanh.f32 %v577_v36 }
 0xd0e   :  { %v1270_v37 = vpop.eup %1269 }
 0xd0f   :  { %580 = vrot.lane.b32.xlu1 %v1270_v37, %s1397_s2 }
 0xd81   :  { %v581_v38 = vpop.permute.xlu1 %580 }
 0xd82   :  { %v583_v39 = vmul.f32 %v1268_v31, %v581_v38  ;;  %v1214_v31 = vpack.c.bf16 %v904_v29, %v903_v28 }
 0xd84   :  { %587 = vrot.lane.b32.xlu0 %v583_v39, %s1398_s25 }
 0xdf6   :  { %v588_v40 = vpop.permute.xlu0 %587 }
 0xdf7   :  { %1130 = vmatmul.mubr.msk.f32.vlgmr.msra.gmra.mrb[4].mxu1 %vm63_vm0, %v588_v40 }
 0xdf8   :  { %1209 = vmatpush3.bf16.msra.mxu1 %v1488_v5  ;;  %1151 = vmatprep.mubr.msk.f32.mxu1 %vm1395_vm1, %v1396_v1 }
 0xdf9   :  { %1210 = vmatprep.subr.bf16.mxu1 %v1394_v0 }
 0xdfc   :  { %1212 = vmatpush3.bf16.msra.mxu1 %v1491_v7 }
 0xeca   :  { %v657_v42 = vpop.f32.mrb[4].mxu1 }
 0xecb   :  { %v661_v43 = vadd.f32 %v657_v42, %v585_v41  ;;  %v1131_v44 = vpop.f32.mrb[5].mxu1 }
 0xecd   :  { %1271 = vtanh.f32 %v661_v43  ;;  %v1014_v46 = vmul.f32 -1.442695, %v661_v43 }
 0xecf   :  { %1273 = vpow2.f32 %v1014_v46 }
 0xed7   :  { %v1272_v45 = vpop.eup %1271 }
 0xed8   :  { %671 = vrot.lane.b32.xlu1 %v1272_v45, %s1397_s2 }
 0xed9   :  { %v1274_v47 = vpop.eup %1273 }
 0xeda   :  { %v665_v48 = vadd.f32 1.0, %v1274_v47 }
 0xedc   :  { %1275 = vrcp.f32 %v665_v48 }
 0xee6   :  { %v1276_v5 = vpop.eup %1275 }
 0xee7   :  { %v669_v51 = vmul.f32 %v1276_v5, %v577_v36 }
 0xf4a   :  { %v672_v49 = vpop.permute.xlu1 %671 }
 0xf4b   :  { %v674_v50 = vmul.f32 %v1276_v5, %v672_v49 }
 0xf4d   :  { %676 = vrot.lane.b32.xlu0 %v674_v50, %s1398_s25 }
 0xfbf   :  { %v677_v7 = vpop.permute.xlu0 %676 }
 0xfc0   :  { %v679_v52 = vadd.f32 %v677_v7, %v669_v51 }
 0xfc2   :  { %1277 = vtanh.f32 %v679_v52 }
 0xfcc   :  { %v1278_v53 = vpop.eup %1277 }
 0xfcd   :  { %682 = vrot.lane.b32.xlu1 %v1278_v53, %s1397_s2 }
0x103f   :  { %v683_v54 = vpop.permute.xlu1 %682 }
0x1040   :  { %v685_v55 = vmul.f32 %v1276_v5, %v683_v54 }
0x1042   :  { %689 = vrot.lane.b32.xlu0 %v685_v55, %s1398_s25 }
0x10b4   :  { %v690_v56 = vpop.permute.xlu0 %689 }
0x10b5   :  { %1141 = vmatmul.mubr.msk.f32.vlgmr.msra.gmra.mrb[6].mxu0 %vm63_vm0, %v690_v56 }
0x10b6   :  { %1162 = vmatprep.mubr.msk.f32.mxu0 %vm1395_vm1, %v1396_v1  ;;  %1215 = vmatpush3.bf16.msra.mxu0 %v1214_v31 }
0x10b7   :  { %1216 = vmatprep.subr.bf16.mxu0 %v1394_v0  ;;  %v1019_v0 = vld [vmem:[%s1600_s3] ss:$0 sm:$0xff] }
0x10ba   :  { %1218 = vmatpush3.bf16.msra.mxu0 %v1217_v33 }
0x1188   :  { %v759_v58 = vpop.f32.mrb[6].mxu0 }
0x1189   :  { %v763_v59 = vadd.f32 %v759_v58, %v687_v57  ;;  %v1142_v60 = vpop.f32.mrb[7].mxu0 }
0x118b   :  { %1279 = vtanh.f32 %v763_v59  ;;  %v1016_v62 = vmul.f32 -1.442695, %v763_v59 }
0x118d   :  { %1281 = vpow2.f32 %v1016_v62 }
0x1195   :  { %v1280_v61 = vpop.eup %1279 }
0x1196   :  { %773 = vrot.lane.b32.xlu1 %v1280_v61, %s1397_s2 }
0x1197   :  { %v1282_v63 = vpop.eup %1281 }
0x1198   :  { %v767_v2 = vadd.f32 1.0, %v1282_v63 }
0x119a   :  { %1283 = vrcp.f32 %v767_v2 }
0x11a4   :  { %v1284_v3 = vpop.eup %1283 }
0x11a5   :  { %v771_v8 = vmul.f32 %v1284_v3, %v679_v52 }
0x1208   :  { %v774_v4 = vpop.permute.xlu1 %773 }
0x1209   :  { %v776_v6 = vmul.f32 %v1284_v3, %v774_v4 }
0x120b   :  { %778 = vrot.lane.b32.xlu0 %v776_v6, %s1398_s25 }
0x127d   :  { %v779_v1 = vpop.permute.xlu0 %778 }
0x127e   :  { %v781_v9 = vadd.f32 %v779_v1, %v771_v8 }
0x1280   :  { %1285 = vtanh.f32 %v781_v9 }
0x128a   :  { %v1286_v10 = vpop.eup %1285 }
0x128b   :  { %784 = vrot.lane.b32.xlu1 %v1286_v10, %s1397_s2 }
0x12fd   :  { %v785_v11 = vpop.permute.xlu1 %784 }
0x12fe   :  { %v787_v12 = vmul.f32 %v1284_v3, %v785_v11 }
0x1300   :  { %791 = vrot.lane.b32.xlu0 %v787_v12, %s1398_s25 }
0x1372   :  { %v792_v13 = vpop.permute.xlu0 %791 }
0x1373   :  { %1152 = vmatmul.mubr.msk.f32.vlgmr.msra.gmra.mrb[6].mxu1 %vm63_vm0, %v792_v13 }
0x1446   :  { %v861_v15 = vpop.f32.mrb[6].mxu1 }
0x1447   :  { %v865_v16 = vadd.f32 %v861_v15, %v789_v14  ;;  %v1153_v17 = vpop.f32.mrb[7].mxu1 }
0x1449   :  { %1287 = vtanh.f32 %v865_v16  ;;  %v1018_v19 = vmul.f32 -1.442695, %v865_v16 }
0x144b   :  { %1289 = vpow2.f32 %v1018_v19 }
0x1453   :  { %v1288_v18 = vpop.eup %1287 }
0x1454   :  { %875 = vrot.lane.b32.xlu1 %v1288_v18, %s1397_s2 }
0x1455   :  { %v1290_v20 = vpop.eup %1289 }
0x1456   :  { %v869_v21 = vadd.f32 1.0, %v1290_v20 }
0x1458   :  { %1291 = vrcp.f32 %v869_v21 }
0x1462   :  { %v1292_v22 = vpop.eup %1291 }
0x1463   :  { %v873_v25 = vmul.f32 %v1292_v22, %v781_v9 }
0x14c6   :  { %v876_v23 = vpop.permute.xlu1 %875 }
0x14c7   :  { %v878_v24 = vmul.f32 %v1292_v22, %v876_v23 }
0x14c9   :  { %880 = vrot.lane.b32.xlu0 %v878_v24, %s1398_s25 }
0x153b   :  { %v881_v26 = vpop.permute.xlu0 %880 }
0x153c   :  { %v883_v27 = vadd.f32 %v881_v26, %v873_v25 }
0x153e   :  { %1293 = vtanh.f32 %v883_v27 }
0x1548   :  { %v1294_v34 = vpop.eup %1293 }
0x1549   :  { %886 = vrot.lane.b32.xlu1 %v1294_v34, %s1397_s2 }
0x154d   :  { %896 = vrot.lane.b32.xlu1 %v883_v27, %s1399_s26 }
0x15bb   :  { %v887_v35 = vpop.permute.xlu1 %886 }
0x15bc   :  { %v889_v36 = vmul.f32 %v1292_v22, %v887_v35 }
0x15be   :  { %891 = vrot.lane.b32.xlu0 %v889_v36, %s1398_s25 }
0x15bf   :  { %v897_v37 = vpop.permute.xlu1 %896 }
0x15c0   :  { %899 = vst.msk [vmem:[#allocation3] sm:$0xff] %vm63_vm0, %v897_v37 }
0x1630   :  { %v892_v38 = vpop.permute.xlu0 %891 }
0x1631   :  { %894 = vst.msk [vmem:[#allocation2] sm:$0xff] %vm63_vm0, %v892_v38  ;;  %1163 = vmatmul.mubr.msk.f32.vlgmr.msra.gmra.mrb[8].mxu0 %vm63_vm0, %v892_v38 }
0x1704   :  { %v982_v39 = vpop.f32.mrb[8].mxu0 }
0x1705   :  { %v983_v40 = vadd.f32 %v1019_v0, %v982_v39  ;;  %v1164_v41 = vpop.f32.mrb[9].mxu0 }
0x1707   :  { %986 = vst [vmem:[#allocation10] sm:$0xff] %v983_v40 }
0x1708   :  { %1372 = shalt.err (!%p1369_p0)
}
0x1709   :  { %s1373_s8 = scalar_lea.hbm %s1601_s4, 128 }
0x170a   :  { %p1374_p1 = scmp.ne.s32.totalorder %s1601_s4, %s1373_s8  ;;  %p1377_p2 = scmp.lt.u32.totalorder %s1373_s8, %s1601_s4 }
0x170c   :  { %p1379_p3 = pnand %p1377_p2, %p1374_p1 }
0x170e   :  { %1382 = shalt.err (!%p1379_p3)
}
0x170f   :  { %996 = dma.vmem_to_hbm [thread:$0]  %s994_s30, 128, %s1601_s4, [#allocation6]  }
0x1710   :  { %1387 = dma.done.wait [#allocation6], 128  }
0x1711   :  { %1388 = vsyncadd [#allocation6], 4294967168 }
0x1712   :  { %1000 = vsyncpa [#allocation5], 1 }
0x1713   :  { %1001 = vsyncpa [#allocation8], 1 }
0x1714   :  { %1002 = vsyncpa [#allocation6], 1 }

</bundles_post_ra>
